<compile_context>
chip_gen: v7x
topology: tpu7x:2x2x1
jax: 0.10.0
libtpu: 0.0.40
codegen_flags: <defaults>
</compile_context>

<pallas_src>
import functools

import jax
import jax.numpy as jnp
from jax.experimental import pallas as pl
from jax.experimental.pallas import tpu as pltpu


def _round_up(x, m):
    return ((x + m - 1) // m) * m


def _tpu_budget():
    """Returns (per-core VMEM capacity bytes, multi_core) with safe fallbacks."""
    vmem_cap = 64 << 20  # conservative default (v7x per-TC VMEM) -> safe everywhere
    cores = 1
    try:
        info = pltpu.get_tpu_info()
        vmem_cap = int(getattr(info, "vmem_capacity_bytes", vmem_cap)) or vmem_cap
        for name in ("num_cores", "core_count", "num_tensorcores", "tensorcore_count"):
            v = getattr(info, name, None)
            if v:
                cores = int(v)
                break
    except Exception:
        pass
    if vmem_cap < (32 << 20):
        vmem_cap = 64 << 20
    # v7x is the only generation with 2 TCs/chip; it is also the only one with
    # <=64 MiB VMEM per TC, so use capacity as a fallback proxy for multi-core.
    multi_core = cores >= 2 or vmem_cap <= (96 << 20)
    return vmem_cap, multi_core


def _gmp_kernel(x_ref, o_ref, *scratch, tl, num_k, rem, neg_fill):
    """Fold 128-lane slabs of the (tr, tl) tile into a (tr, 128) running max.

    x_ref: (tr, tl) input tile.  o_ref: (tr, 1) output (resident across the lane axis).
    scratch[0]: (tr, 128) running-max accumulator, present only when num_k > 1.
    Statics: tl = lane tile, num_k = number of lane tiles, rem = valid lanes in the last
    lane tile, neg_fill = identity element for max in the input dtype.
    """
    k = pl.program_id(1)

    def fold(acc, n_full, n_partial):
        # Pure VPU: elementwise max over 128-lane slabs.  Only the (single, statically
        # known) boundary slab pays for the iota+where mask; fully-OOB slabs are skipped.
        for j in range(n_full):
            slab = x_ref[:, j * 128:(j + 1) * 128]
            acc = slab if acc is None else jnp.maximum(acc, slab)
        if n_partial:
            slab = x_ref[:, n_full * 128:(n_full + 1) * 128]
            lane = jax.lax.broadcasted_iota(jnp.int32, slab.shape, 1)
            slab = jnp.where(lane < n_partial, slab, jnp.full_like(slab, neg_fill))
            acc = slab if acc is None else jnp.maximum(acc, slab)
        return acc

    def finish(acc):
        # One cross-lane (XLU) reduce + narrow store, once per row tile only.
        o_ref[...] = jnp.max(acc, axis=-1, keepdims=True).astype(o_ref.dtype)

    if num_k == 1:
        # Whole reduction fits one lane tile: no scratch, no accumulator round-trips.
        finish(fold(None, rem // 128, rem % 128))
        return

    acc_ref = scratch[0]

    @pl.when(k == 0)
    def _():
        acc_ref[...] = jnp.full(acc_ref.shape, neg_fill, dtype=acc_ref.dtype)

    if rem == tl:
        # All lane tiles are full: identical body on every k step, no masking anywhere.
        acc = fold(acc_ref[...], tl // 128, 0)
        acc_ref[...] = acc

        @pl.when(k == num_k - 1)
        def _():
            finish(acc)
    else:
        @pl.when(k < num_k - 1)
        def _():
            acc_ref[...] = fold(acc_ref[...], tl // 128, 0)

        @pl.when(k == num_k - 1)
        def _():
            finish(fold(acc_ref[...], rem // 128, rem % 128))


def gmp(x, keepdim=True, *, tr=None, tl=None):
    """Global max pool over the spatial dims of an NCHW tensor.

    Args:
      x: array of shape (N, C, H, W).
      keepdim: if True return (N, C, 1, 1); else return (N, C).
      tr, tl: optional tile-size overrides (rows tile, lanes tile) for testing.
    """
    n, c, h, w = x.shape
    rows = n * c
    lanes = h * w
    x2d = x.reshape(rows, lanes)

    dtype = x.dtype
    itemsize = jnp.dtype(dtype).itemsize
    sublane = 8 * max(1, 4 // itemsize)  # 8 f32 / 16 bf16,f16 / 32 int8
    rows_p = _round_up(rows, sublane)
    lanes_p = _round_up(lanes, 128)

    vmem_cap, multi_core = _tpu_budget()
    # Per-input-buffer byte target; inputs are double-buffered so ~2x this (plus the
    # accumulator and slab temporaries) must fit comfortably under per-core VMEM.
    target = int(min(16 << 20, max(4 << 20, vmem_cap // 8)))

    if tl is None:
        # Prefer covering the whole reduction in one lane tile (no scratch, no revisits);
        # cap the per-step slab-loop unroll at 64 slabs and keep room for >=1 sublane row.
        tl = min(lanes_p, 64 * 128,
                 max(128, (target // (sublane * itemsize)) // 128 * 128))
    tl = max(128, _round_up(tl, 128))

    if tr is None:
        tr = max(sublane, (target // (tl * itemsize)) // sublane * sublane)
    tr = max(sublane, _round_up(tr, sublane))
    tr = min(tr, rows_p)

    # On a 2-TC chip keep >=2 row tiles when possible so ("parallel", ...) can shard the
    # row axis across TensorCores; only split when each half-tile still moves >=1 MiB so
    # the per-grid-step overhead stays amortized (harmless on single-TC chips).
    if multi_core and tr >= rows_p and rows_p >= 2 * sublane:
        half = _round_up((rows_p + 1) // 2, sublane)
        if half * min(tl, lanes_p) * itemsize >= (1 << 20):
            tr = half

    grid_rows = pl.cdiv(rows, tr)
    num_k = pl.cdiv(lanes, tl)
    rem = lanes - (num_k - 1) * tl  # valid lanes in the last lane tile (1..tl)

    if jnp.issubdtype(dtype, jnp.floating):
        neg_fill = float(-jnp.inf)   # native-dtype accumulation: max is exact in any dtype
    else:
        neg_fill = int(jnp.iinfo(dtype).min)

    kernel = functools.partial(_gmp_kernel, tl=tl, num_k=num_k, rem=rem,
                               neg_fill=neg_fill)

    scratch_shapes = [] if num_k == 1 else [pltpu.VMEM((tr, 128), dtype)]

    # VMEM budget sized to the actual tiles: 2x double-buffered input + accumulator +
    # output + slab/iota temporaries + headroom; capped by the queried per-core capacity.
    tile_bytes = tr * tl * itemsize
    acc_bytes = 0 if num_k == 1 else tr * 128 * itemsize
    tmp_bytes = 4 * tr * 128 * max(itemsize, 4)
    needed = 2 * tile_bytes + acc_bytes + 2 * tr * itemsize + tmp_bytes + (2 << 20)
    vmem_limit_bytes = int(min(vmem_cap, max(needed, 16 << 20)))

    out2d = pl.pallas_call(
        kernel,
        out_shape=jax.ShapeDtypeStruct((rows, 1), dtype),
        grid_spec=pltpu.PrefetchScalarGridSpec(
            num_scalar_prefetch=0,
            grid=(grid_rows, num_k),
            in_specs=[pl.BlockSpec((tr, tl), lambda i, k: (i, k))],
            out_specs=pl.BlockSpec((tr, 1), lambda i, k: (i, 0)),
            scratch_shapes=scratch_shapes,
        ),
        compiler_params=pltpu.CompilerParams(
            dimension_semantics=("parallel", "arbitrary"),
            vmem_limit_bytes=vmem_limit_bytes,
        ),
        cost_estimate=pl.CostEstimate(
            flops=rows * lanes,           # advisory: comparisons counted as flops
            transcendentals=0,
            bytes_accessed=rows * lanes * itemsize + rows * itemsize,
        ),
    )(x2d)

    if keepdim:
        return out2d.reshape(n, c, 1, 1)
    return out2d.reshape(n, c)


if __name__ == "__main__":
    key = jax.random.PRNGKey(0)
    k1, k2, k3, k4 = jax.random.split(key, 4)

    # Primary small test (typical NCHW input for this module).
    x = jax.random.normal(k1, (2, 4, 16, 16), dtype=jnp.float32)
    out = gmp(x, keepdim=True)
    jax.block_until_ready(out)
    ref = jnp.max(x, axis=(2, 3), keepdims=True)
    assert out.shape == (2, 4, 1, 1), out.shape
    assert jnp.array_equal(out, ref), "mismatch vs reference (keepdim)"

    out_flat = gmp(x, keepdim=False)
    jax.block_until_ready(out_flat)
    assert out_flat.shape == (2, 4), out_flat.shape
    assert jnp.array_equal(out_flat, ref.reshape(2, 4)), "mismatch vs reference (flat)"

    # Non-divisible spatial size (7x7 = 49 lanes) -> exercises the boundary-slab mask.
    x2 = jax.random.normal(k2, (2, 3, 7, 7), dtype=jnp.float32)
    out2 = gmp(x2)
    jax.block_until_ready(out2)
    assert jnp.array_equal(out2, jnp.max(x2, axis=(2, 3), keepdims=True)), \
        "mismatch vs reference (edge mask)"

    # Forced small tiles -> multi-step lane reduction (accumulator path), a partial last
    # slab in the last lane tile, and multiple row tiles with a padded edge row tile.
    x3 = jax.random.normal(k3, (3, 8, 50, 50), dtype=jnp.float32)  # rows=24, lanes=2500
    out3 = gmp(x3, tr=16, tl=1024)
    jax.block_until_ready(out3)
    assert jnp.array_equal(out3, jnp.max(x3, axis=(2, 3), keepdims=True)), \
        "mismatch vs reference (multi-step reduction)"

    # bf16 path: native-dtype accumulation (max is exact in any dtype).
    x4 = jax.random.normal(k4, (2, 4, 16, 16), dtype=jnp.bfloat16)
    out4 = gmp(x4)
    jax.block_until_ready(out4)
    assert jnp.array_equal(out4, jnp.max(x4, axis=(2, 3), keepdims=True)), \
        "mismatch vs reference (bf16)"

    print("KERNEL_OK")
</pallas_src>

<mosaic_0001>
module attributes {stable_mosaic.version = 11 : i64} {
  func.func @_gmp_kernel(%arg0: i32, %arg1: i32, %arg2: memref<8x256xf32, #tpu.memory_space<vmem>>, %arg3: memref<8x1xf32, #tpu.memory_space<vmem>>) attributes {dimension_semantics = [#tpu.dimension_semantics<parallel>, #tpu.dimension_semantics<arbitrary>], iteration_bounds = array<i64: 1, 1>, scalar_prefetch = 0 : i64, scratch_operands = 0 : i64, tpu.core_type = #tpu.core_type<tc>, window_params = [{transform_indices = @transform_0, window_bounds = array<i64: 8, 256>}, {transform_indices = @transform_1, window_bounds = array<i64: 8, 1>}]} {
    %c0 = arith.constant 0 : index
    %c0_0 = arith.constant 0 : index
    %0 = vector.load %arg2[%c0, %c0_0] : memref<8x256xf32, #tpu.memory_space<vmem>>, vector<8x128xf32>
    %c0_1 = arith.constant 0 : index
    %c128 = arith.constant 128 : index
    %1 = vector.load %arg2[%c0_1, %c128] : memref<8x256xf32, #tpu.memory_space<vmem>>, vector<8x128xf32>
    %2 = arith.maximumf %0, %1 : vector<8x128xf32>
    %cst = arith.constant dense<0xFF800000> : vector<8xf32>
    %3 = vector.multi_reduction <maximumf>, %2, %cst [1] : vector<8x128xf32> to vector<8xf32>
    %4 = vector.shape_cast %3 : vector<8xf32> to vector<8x1xf32>
    %c0_2 = arith.constant 0 : index
    %c0_3 = arith.constant 0 : index
    %5 = vector.load %arg3[%c0_2, %c0_3] : memref<8x1xf32, #tpu.memory_space<vmem>>, vector<8x1xf32>
    tpu.vector_store %arg3[%c0_2, %c0_3], %4 {strides = array<i32>} : memref<8x1xf32, #tpu.memory_space<vmem>>, vector<8x1xf32>,
    return
  }
  func.func @transform_0(%arg0: i32, %arg1: i32) -> (i32, i32) {
    %c0_i32 = arith.constant 0 : i32
    return %arg0, %arg1 : i32, i32
  }
  func.func @transform_1(%arg0: i32, %arg1: i32) -> (i32, i32) {
    %c0_i32 = arith.constant 0 : i32
    %c0_i32_0 = arith.constant 0 : i32
    return %arg0, %c0_i32 : i32, i32
  }
}

</mosaic_0001>

<bundles_post_ra>
// kernel: tpu_custom_call.1
= control target key start
LH: loop header
LB: loop body
LE: loop exit
PB: predicated region body
PF: predicated region fallthrough
CT: control target
= control target key end

     0   :  { %6 = vsyncpa [#allocation3], 0  ;;  %s57_s6 = smov [#allocation2]   ;;  %s83_s0 = inlined_call_operand.hbm [shape: f32[8,256], index: 0, kind: input, shape index: {}]   ;;  %s84_s1 = inlined_call_operand.vmem [shape: f32[8,1], index: 1, kind: output, shape index: {}]  }
   0x1   :  { %s13_s7 = sshll.u32 %s57_s6, 4  ;;  %s33_s10 = scalar_lea.hbm %s83_s0, 256  ;;  %s14_s7 = int_to_ptr.vmem [resolvable:$true] %s13_s7 }
   0x2   :  { %p34_p0 = scmp.ne.s32.totalorder %s83_s0, %s33_s10  ;;  %p37_p1 = scmp.lt.u32.totalorder %s33_s10, %s83_s0 }
   0x4   :  { %p39_p2 = pnand %p37_p1, %p34_p0 }
   0x6   :  { %42 = shalt.err (!%p39_p2)
}
   0x7   :  { %s43_s15 = scalar_lea.vmem %s14_s7, 256  ;;  %p48_p4 = scmp.lt.s32.totalorder %s14_s7, %s14_s7 }
   0x8   :  { %p44_p3 = scmp.ne.s32.totalorder %s14_s7, %s43_s15  ;;  %p49_p5 = scmp.lt.s32.totalorder %s43_s15, %s43_s15 }
   0xa   :  { %p50_p6 = por %p49_p5, %p48_p4 }
   0xc   :  { %p51_p7 = pnand %p50_p6, %p44_p3 }
   0xe   :  { %54 = shalt.err (!%p51_p7)
}
   0xf   :  { %16 = dma.hbm_to_vmem [thread:$0]  %s83_s0, 256, %s14_s7, [#allocation3]  }
  0x10   :  { %55 = dma.done.wait [#allocation3], 256  }
  0x11   :  { %56 = vsyncadd [#allocation3], 4294967040  ;;  %v20_v0 = vld [vmem:[#allocation2] sm:$0xff]  ;;  %v21_v1 = vld [vmem:[#allocation2 + $0x8] sm:$0xff]  ;;  %vm25_vm0 = vcmask 7168  }
  0x12   :  { %v22_v2 = vmax.f32 %v20_v0, %v21_v1 }
  0x14   :  { %23 = vmax.xlane.f32.xlu0 %v22_v2 }
  0xa1   :  { %v24_v3 = vpop.xlane.xlu0 %23 }
  0xa2   :  { %26 = vst.msk [vmem:[%s84_s1] sm:$0xff] %vm25_vm0, %v24_v3 }
  0xa3   :  { %31 = vsyncpa [#allocation3], 1 }

</bundles_post_ra>
